<compile_context>
chip_gen: v5e
topology: v5e:2x2
jax: 0.10.0
libtpu: 0.0.40
codegen_flags: <defaults>
</compile_context>

<pallas_src>
import jax
import jax.numpy as jnp
from jax.experimental import pallas as pl
from jax.experimental.pallas import tpu as pltpu


def merge_modalities_kernel(pose_ref, face_ref, wa_ref, wb_ref, c_ref,
                            wv_ref, wvb_ref, wd_ref, out_ref):
    pose = pose_ref[...]                     # (TB, dim_pose)
    face = face_ref[...]                     # (TB, dim_face)

    # pre-activation inner state; all q/k linears + biases folded into wa/wb/c
    pre = (jnp.dot(pose, wa_ref[...], preferred_element_type=jnp.float32)
           + jnp.dot(face, wb_ref[...], preferred_element_type=jnp.float32)
           + c_ref[...])                     # (TB, dim_inner)
    a_t = jnp.tanh(pre)                      # EUP transcendental

    # v = WV(face)
    v = jnp.dot(face, wv_ref[...], preferred_element_type=jnp.float32) + wvb_ref[...]

    # e.T = a.T @ WD
    e_t = jnp.dot(a_t, wd_ref[...], preferred_element_type=jnp.float32)   # (TB, dimV)

    out_ref[...] = (v * e_t).astype(out_ref.dtype)


def merge_modalities(face, pose, params, *, tb_max=512):
    """face: (B, dim_face), pose: (B, dim_pose). Returns (B, dimV) float32."""
    B, dim_face = face.shape
    _, dim_pose = pose.shape
    dim_inner, dimV = params["wd"].shape
    dim_inner, dimV = int(dim_inner), int(dimV)

    # ---- fold WQ/WK (+ all biases) into the inner weights (exact algebra) ----
    wa = params["wq_w"] @ params["w1_t"]                      # (dim_pose, dim_inner)
    wb = params["wk_w"] @ params["w2_t"]                      # (dim_face, dim_inner)
    c = (params["wq_b"] @ params["w1_t"]
         + params["wk_b"] @ params["w2_t"]
         + params["b"])                                       # (1, dim_inner)
    wv, wvb, wd = params["wv_w"], params["wv_b"], params["wd"]

    # ---- batch tiling (TB rows per grid step; pad B if needed) ----
    if B > tb_max:
        TB = tb_max                          # multiple of 8 -> clean sublane tiling
        B_pad = pl.cdiv(B, TB) * TB
    else:
        TB, B_pad = B, B                     # single step; block == full array
    if B_pad != B:
        pad = ((0, B_pad - B), (0, 0))
        face = jnp.pad(face, pad)
        pose = jnp.pad(pose, pad)

    grid = (B_pad // TB,)
    row = lambda i: (i, 0)                   # streamed, pipelined per batch tile
    const = lambda i: (0, 0)                 # VMEM-resident, DMA'd once

    flops = 2 * B_pad * (dim_pose * dim_inner + dim_face * dim_inner
                         + dim_face * dimV + dim_inner * dimV)
    bytes_accessed = 4 * (pose.size + face.size + wa.size + wb.size + c.size
                          + wv.size + wvb.size + wd.size + B_pad * dimV)

    out = pl.pallas_call(
        merge_modalities_kernel,
        out_shape=jax.ShapeDtypeStruct((B_pad, dimV), jnp.float32),
        grid=grid,
        in_specs=[
            pl.BlockSpec((TB, dim_pose), row),
            pl.BlockSpec((TB, dim_face), row),
            pl.BlockSpec(wa.shape, const),
            pl.BlockSpec(wb.shape, const),
            pl.BlockSpec(c.shape, const),
            pl.BlockSpec(wv.shape, const),
            pl.BlockSpec(wvb.shape, const),
            pl.BlockSpec(wd.shape, const),
        ],
        out_specs=pl.BlockSpec((TB, dimV), row),
        compiler_params=pltpu.CompilerParams(
            dimension_semantics=("parallel",),      # v7x: shard batch tiles over 2 TCs
            vmem_limit_bytes=32 * 1024 * 1024,      # safe on every gen (v7x: 64 MiB phys)
        ),
        cost_estimate=pl.CostEstimate(
            flops=int(flops),
            transcendentals=int(B_pad * dim_inner),
            bytes_accessed=int(bytes_accessed),
        ),
    )(pose, face, wa, wb, c, wv, wvb, wd)

    return out[:B] if B_pad != B else out


def init_params(key, dim_inner, dim_face, dim_pose, dim_kq):
    """Deterministic synthetic init matching the module's parameter shapes."""
    dimV = dim_face + dim_pose  # value_transform=True
    keys = jax.random.split(key, 12)

    def uniform_pm(k, shape, scale):
        return (jax.random.uniform(k, shape, jnp.float32) - 0.5) * 2.0 * scale

    # nn.Linear weights are (out, in) in PyTorch; store pre-transposed (in, out).
    wq_w = uniform_pm(keys[0], (dim_pose, dim_kq), (1.0 / dim_pose) ** 0.5)
    wq_b = uniform_pm(keys[1], (1, dim_kq), (1.0 / dim_pose) ** 0.5)
    wk_w = uniform_pm(keys[2], (dim_face, dim_kq), (1.0 / dim_face) ** 0.5)
    wk_b = uniform_pm(keys[3], (1, dim_kq), (1.0 / dim_face) ** 0.5)
    wv_w = uniform_pm(keys[4], (dim_face, dimV), (1.0 / dim_face) ** 0.5)
    wv_b = uniform_pm(keys[5], (1, dimV), (1.0 / dim_face) ** 0.5)

    wd = uniform_pm(keys[6], (dim_inner, dimV), (1.0 / dimV) ** 0.5)
    w1_t = uniform_pm(keys[7], (dim_inner, dim_kq), (1.0 / dim_kq) ** 0.5).T
    w2_t = uniform_pm(keys[8], (dim_inner, dim_kq), (1.0 / dim_kq) ** 0.5).T
    b = jax.random.normal(keys[9], (1, dim_inner), jnp.float32)

    return dict(wq_w=wq_w, wq_b=wq_b, wk_w=wk_w, wk_b=wk_b, wv_w=wv_w, wv_b=wv_b,
                w1_t=w1_t, w2_t=w2_t, b=b, wd=wd)


def reference(face, pose, p):
    # Unfused reference matching the PyTorch module exactly.
    q = pose @ p["wq_w"] + p["wq_b"]
    k = face @ p["wk_w"] + p["wk_b"]
    v = face @ p["wv_w"] + p["wv_b"]
    a_t = jnp.tanh(q @ p["w1_t"] + k @ p["w2_t"] + p["b"])
    e_t = a_t @ p["wd"]
    return v * e_t


if __name__ == "__main__":
    dim_inner, dim_face, dim_pose, dim_kq = 32, 16, 16, 32
    dimV = dim_face + dim_pose

    key = jax.random.PRNGKey(0)
    k_face, k_pose, k_params, k_face2, k_pose2 = jax.random.split(key, 5)
    params = init_params(k_params, dim_inner, dim_face, dim_pose, dim_kq)

    # Small single-tile case (B=8): one grid step, blocks == full arrays.
    B = 8
    face = jax.random.normal(k_face, (B, dim_face), jnp.float32)
    pose = jax.random.normal(k_pose, (B, dim_pose), jnp.float32)
    out = jax.block_until_ready(merge_modalities(face, pose, params))
    ref = reference(face, pose, params)
    assert out.shape == (B, dimV)
    # Folding changes rounding order -> slightly looser tolerance than 1e-5.
    assert jnp.allclose(out, ref, atol=1e-4, rtol=1e-4), "mismatch vs reference (B=8)"

    # Gridded / padded case (B=272, tb_max=128 -> padded to 384, grid=(3,), TB=128).
    B2 = 272
    face2 = jax.random.normal(k_face2, (B2, dim_face), jnp.float32)
    pose2 = jax.random.normal(k_pose2, (B2, dim_pose), jnp.float32)
    out2 = jax.block_until_ready(merge_modalities(face2, pose2, params, tb_max=128))
    ref2 = reference(face2, pose2, params)
    assert out2.shape == (B2, dimV)
    assert jnp.allclose(out2, ref2, atol=1e-4, rtol=1e-4), "mismatch vs reference (B=272)"

    # TODO(synk): the module's debug `print(e.T.shape)` and nn.Identity feature_importance
    # are intentionally omitted (no-ops w.r.t. the computed output).
    print("KERNEL_OK")
</pallas_src>

<mosaic_0001>
module attributes {stable_mosaic.version = 11 : i64} {
  func.func @merge_modalities_kernel(%arg0: i32, %arg1: memref<8x16xf32, #tpu.memory_space<vmem>>, %arg2: memref<8x16xf32, #tpu.memory_space<vmem>>, %arg3: memref<16x32xf32, #tpu.memory_space<vmem>>, %arg4: memref<16x32xf32, #tpu.memory_space<vmem>>, %arg5: memref<1x32xf32, #tpu.memory_space<vmem>>, %arg6: memref<16x32xf32, #tpu.memory_space<vmem>>, %arg7: memref<1x32xf32, #tpu.memory_space<vmem>>, %arg8: memref<32x32xf32, #tpu.memory_space<vmem>>, %arg9: memref<8x32xf32, #tpu.memory_space<vmem>>) attributes {dimension_semantics = [#tpu.dimension_semantics<parallel>], iteration_bounds = array<i64: 1>, scalar_prefetch = 0 : i64, scratch_operands = 0 : i64, tpu.core_type = #tpu.core_type<tc>, window_params = [{transform_indices = @transform_0, window_bounds = array<i64: 8, 16>}, {transform_indices = @transform_1, window_bounds = array<i64: 8, 16>}, {pipeline_mode = #tpu.pipeline_mode<synchronous>, transform_indices = @transform_2, window_bounds = array<i64: 16, 32>}, {pipeline_mode = #tpu.pipeline_mode<synchronous>, transform_indices = @transform_3, window_bounds = array<i64: 16, 32>}, {pipeline_mode = #tpu.pipeline_mode<synchronous>, transform_indices = @transform_4, window_bounds = array<i64: 1, 32>}, {pipeline_mode = #tpu.pipeline_mode<synchronous>, transform_indices = @transform_5, window_bounds = array<i64: 16, 32>}, {pipeline_mode = #tpu.pipeline_mode<synchronous>, transform_indices = @transform_6, window_bounds = array<i64: 1, 32>}, {pipeline_mode = #tpu.pipeline_mode<synchronous>, transform_indices = @transform_7, window_bounds = array<i64: 32, 32>}, {transform_indices = @transform_8, window_bounds = array<i64: 8, 32>}]} {
    %c0 = arith.constant 0 : index
    %c0_0 = arith.constant 0 : index
    %0 = vector.load %arg1[%c0, %c0_0] : memref<8x16xf32, #tpu.memory_space<vmem>>, vector<8x16xf32>
    %c0_1 = arith.constant 0 : index
    %c0_2 = arith.constant 0 : index
    %1 = vector.load %arg2[%c0_1, %c0_2] : memref<8x16xf32, #tpu.memory_space<vmem>>, vector<8x16xf32>
    %c0_3 = arith.constant 0 : index
    %c0_4 = arith.constant 0 : index
    %2 = vector.load %arg3[%c0_3, %c0_4] : memref<16x32xf32, #tpu.memory_space<vmem>>, vector<16x32xf32>
    %cst = arith.constant dense<0.000000e+00> : vector<8x32xf32>
    %3 = tpu.matmul %0, %2, %cst {dimension_numbers = #tpu.dot_dimension_numbers<[1], [0], [0], [1], [0, 0, 1, 1], [], []>} : vector<8x16xf32>, vector<16x32xf32>, vector<8x32xf32> -> vector<8x32xf32>
    %c0_5 = arith.constant 0 : index
    %c0_6 = arith.constant 0 : index
    %4 = vector.load %arg4[%c0_5, %c0_6] : memref<16x32xf32, #tpu.memory_space<vmem>>, vector<16x32xf32>
    %cst_7 = arith.constant dense<0.000000e+00> : vector<8x32xf32>
    %5 = tpu.matmul %1, %4, %cst_7 {dimension_numbers = #tpu.dot_dimension_numbers<[1], [0], [0], [1], [0, 0, 1, 1], [], []>} : vector<8x16xf32>, vector<16x32xf32>, vector<8x32xf32> -> vector<8x32xf32>
    %6 = arith.addf %3, %5 : vector<8x32xf32>
    %c0_8 = arith.constant 0 : index
    %c0_9 = arith.constant 0 : index
    %7 = vector.load %arg5[%c0_8, %c0_9] : memref<1x32xf32, #tpu.memory_space<vmem>>, vector<1x32xf32>
    %8 = vector.broadcast %7 : vector<1x32xf32> to vector<8x32xf32>
    %9 = arith.addf %6, %8 : vector<8x32xf32>
    %10 = math.tanh %9 : vector<8x32xf32>
    %c0_10 = arith.constant 0 : index
    %c0_11 = arith.constant 0 : index
    %11 = vector.load %arg6[%c0_10, %c0_11] : memref<16x32xf32, #tpu.memory_space<vmem>>, vector<16x32xf32>
    %cst_12 = arith.constant dense<0.000000e+00> : vector<8x32xf32>
    %12 = tpu.matmul %1, %11, %cst_12 {dimension_numbers = #tpu.dot_dimension_numbers<[1], [0], [0], [1], [0, 0, 1, 1], [], []>} : vector<8x16xf32>, vector<16x32xf32>, vector<8x32xf32> -> vector<8x32xf32>
    %c0_13 = arith.constant 0 : index
    %c0_14 = arith.constant 0 : index
    %13 = vector.load %arg7[%c0_13, %c0_14] : memref<1x32xf32, #tpu.memory_space<vmem>>, vector<1x32xf32>
    %14 = vector.broadcast %13 : vector<1x32xf32> to vector<8x32xf32>
    %15 = arith.addf %12, %14 : vector<8x32xf32>
    %c0_15 = arith.constant 0 : index
    %c0_16 = arith.constant 0 : index
    %16 = vector.load %arg8[%c0_15, %c0_16] : memref<32x32xf32, #tpu.memory_space<vmem>>, vector<32x32xf32>
    %cst_17 = arith.constant dense<0.000000e+00> : vector<8x32xf32>
    %17 = tpu.matmul %10, %16, %cst_17 {dimension_numbers = #tpu.dot_dimension_numbers<[1], [0], [0], [1], [0, 0, 1, 1], [], []>} : vector<8x32xf32>, vector<32x32xf32>, vector<8x32xf32> -> vector<8x32xf32>
    %18 = arith.mulf %15, %17 : vector<8x32xf32>
    %c0_18 = arith.constant 0 : index
    %c0_19 = arith.constant 0 : index
    %19 = vector.load %arg9[%c0_18, %c0_19] : memref<8x32xf32, #tpu.memory_space<vmem>>, vector<8x32xf32>
    tpu.vector_store %arg9[%c0_18, %c0_19], %18 {strides = array<i32>} : memref<8x32xf32, #tpu.memory_space<vmem>>, vector<8x32xf32>,
    return
  }
  func.func @transform_0(%arg0: i32) -> (i32, i32) {
    %c0_i32 = arith.constant 0 : i32
    %c0_i32_0 = arith.constant 0 : i32
    return %arg0, %c0_i32 : i32, i32
  }
  func.func @transform_1(%arg0: i32) -> (i32, i32) {
    %c0_i32 = arith.constant 0 : i32
    %c0_i32_0 = arith.constant 0 : i32
    return %arg0, %c0_i32 : i32, i32
  }
  func.func @transform_2(%arg0: i32) -> (i32, i32) {
    %c0_i32 = arith.constant 0 : i32
    %c0_i32_0 = arith.constant 0 : i32
    %c0_i32_1 = arith.constant 0 : i32
    return %c0_i32, %c0_i32_0 : i32, i32
  }
  func.func @transform_3(%arg0: i32) -> (i32, i32) {
    %c0_i32 = arith.constant 0 : i32
    %c0_i32_0 = arith.constant 0 : i32
    %c0_i32_1 = arith.constant 0 : i32
    return %c0_i32, %c0_i32_0 : i32, i32
  }
  func.func @transform_4(%arg0: i32) -> (i32, i32) {
    %c0_i32 = arith.constant 0 : i32
    %c0_i32_0 = arith.constant 0 : i32
    %c0_i32_1 = arith.constant 0 : i32
    return %c0_i32, %c0_i32_0 : i32, i32
  }
  func.func @transform_5(%arg0: i32) -> (i32, i32) {
    %c0_i32 = arith.constant 0 : i32
    %c0_i32_0 = arith.constant 0 : i32
    %c0_i32_1 = arith.constant 0 : i32
    return %c0_i32, %c0_i32_0 : i32, i32
  }
  func.func @transform_6(%arg0: i32) -> (i32, i32) {
    %c0_i32 = arith.constant 0 : i32
    %c0_i32_0 = arith.constant 0 : i32
    %c0_i32_1 = arith.constant 0 : i32
    return %c0_i32, %c0_i32_0 : i32, i32
  }
  func.func @transform_7(%arg0: i32) -> (i32, i32) {
    %c0_i32 = arith.constant 0 : i32
    %c0_i32_0 = arith.constant 0 : i32
    %c0_i32_1 = arith.constant 0 : i32
    return %c0_i32, %c0_i32_0 : i32, i32
  }
  func.func @transform_8(%arg0: i32) -> (i32, i32) {
    %c0_i32 = arith.constant 0 : i32
    %c0_i32_0 = arith.constant 0 : i32
    return %arg0, %c0_i32 : i32, i32
  }
}

</mosaic_0001>

<bundles_post_ra>
// kernel: tpu_custom_call.1
= control target key start
LH: loop header
LB: loop body
LE: loop exit
PB: predicated region body
PF: predicated region fallthrough
CT: control target
= control target key end

     0   :  { %13 = vsyncpa [#allocation3], 0  ;;  %s534_s0 = inlined_call_operand.hbm [shape: f32[8,16], index: 0, kind: input, shape index: {}]   ;;  %s535_s1 = inlined_call_operand.hbm [shape: f32[8,16], index: 1, kind: input, shape index: {}]   ;;  %s536_s2 = inlined_call_operand.hbm [shape: f32[16,32], index: 2, kind: input, shape index: {}]   ;;  %s537_s3 = inlined_call_operand.hbm [shape: f32[16,32], index: 3, kind: input, shape index: {}]   ;;  %s538_s4 = inlined_call_operand.vmem [shape: f32[1,32], index: 4, kind: input, shape index: {}]   ;;  %s539_s5 = inlined_call_operand.hbm [shape: f32[16,32], index: 5, kind: input, shape index: {}]   ;;  %s540_s6 = inlined_call_operand.vmem [shape: f32[1,32], index: 6, kind: input, shape index: {}]   ;;  %s541_s7 = inlined_call_operand.hbm [shape: f32[32,32], index: 7, kind: input, shape index: {}]   ;;  %s542_s8 = inlined_call_operand.hbm [shape: f32[8,32], index: 8, kind: output, shape index: {}]  }
   0x1   :  { %14 = vsyncpa [#allocation6], 0 }
   0x2   :  { %15 = vsyncpa [#allocation9], 0 }
   0x3   :  { %16 = vsyncpa [#allocation12], 0  ;;  %s34_s29 = sshll.u32 %s535_s1, 4  ;;  %s35_s29 = int_to_ptr.hbm [resolvable:$true] %s34_s29 }
   0x4   :  { %17 = vsyncpa [#allocation4], 0  ;;  %s450_s30 = smov [#allocation5]   ;;  %s57_s12 = sshll.u32 %s537_s3, 4  ;;  %s58_s12 = int_to_ptr.hbm [resolvable:$true] %s57_s12 }
   0x5   :  { %s36_s9 = sshll.u32 %s450_s30, 4  ;;  %s451_s13 = smov [#allocation8]   ;;  %s37_s9 = int_to_ptr.vmem [resolvable:$true] %s36_s9 }
   0x6   :  { %39 = dma.hbm_to_vmem [thread:$0]  %s35_s29, 128, %s37_s9, [#allocation6]  }
   0x7   :  { %s59_s14 = sshll.u32 %s451_s13, 4  ;;  %s23_s17 = sshll.u32 %s534_s0, 4  ;;  %s60_s14 = int_to_ptr.vmem [resolvable:$true] %s59_s14  ;;  %s24_s17 = int_to_ptr.hbm [resolvable:$true] %s23_s17 }
   0x8   :  { %s452_s1 = smov 128   ;;  %s453_s18 = smov 8  }
   0x9   :  { %65 = dma.hbm_to_vmem [thread:$0]  %s58_s12, 256, %s60_s14, [#allocation9], %s452_s1, %s452_s1, %s453_s18  }
   0xa   :  { %s44_s21 = sshll.u32 %s536_s2, 4  ;;  %s454_s22 = smov [#allocation2]   ;;  %s45_s21 = int_to_ptr.hbm [resolvable:$true] %s44_s21 }
   0xb   :  { %s25_s23 = sshll.u32 %s454_s22, 4  ;;  %s455_s3 = smov [#allocation7]   ;;  %s26_s23 = int_to_ptr.vmem [resolvable:$true] %s25_s23 }
   0xc   :  { %28 = dma.hbm_to_vmem [thread:$0]  %s24_s17, 128, %s26_s23, [#allocation3]  }
   0xd   :  { %s46_s24 = sshll.u32 %s455_s3, 4  ;;  %s72_s0 = sshll.u32 %s539_s5, 4  ;;  %s47_s24 = int_to_ptr.vmem [resolvable:$true] %s46_s24  ;;  %s73_s0 = int_to_ptr.hbm [resolvable:$true] %s72_s0 }
   0xe   :  { %52 = dma.hbm_to_vmem [thread:$0]  %s45_s21, 256, %s47_s24, [#allocation6], %s452_s1, %s452_s1, %s453_s18  }
   0xf   :  { %s87_s29 = sshll.u32 %s541_s7, 4  ;;  %s456_s30 = smov [#allocation10]   ;;  %s88_s29 = int_to_ptr.hbm [resolvable:$true] %s87_s29 }
  0x10   :  { %s74_s2 = sshll.u32 %s456_s30, 4  ;;  %s457_s9 = smov [#allocation11]   ;;  %s75_s2 = int_to_ptr.vmem [resolvable:$true] %s74_s2 }
  0x11   :  { %80 = dma.hbm_to_vmem [thread:$0]  %s73_s0, 256, %s75_s2, [#allocation9], %s452_s1, %s452_s1, %s453_s18  }
  0x12   :  { %s89_s10 = sshll.u32 %s457_s9, 4  ;;  %s90_s10 = int_to_ptr.vmem [resolvable:$true] %s89_s10 }
  0x13   :  { %95 = dma.hbm_to_vmem [thread:$0]  %s88_s29, 512, %s90_s10, [#allocation12], %s452_s1, %s452_s1, %s453_s18  }
  0x14   :  { %440 = dma.done.wait [#allocation3], 128  }
  0x15   :  { %441 = vsyncadd [#allocation3], 4294967168 }
  0x16   :  { %442 = dma.done.wait [#allocation6], 384  }
  0x17   :  { %443 = vsyncadd [#allocation6], 4294966912 }
  0x18   :  { %444 = dma.done.wait [#allocation9], 512  }
  0x19   :  { %445 = vsyncadd [#allocation9], 4294966784 }
  0x1a   :  { %446 = dma.done.wait [#allocation12], 512  }
  0x1b   :  { %447 = vsyncadd [#allocation12], 4294966784  ;;  %v125_v0 = vld [vmem:[#allocation8 + $0x8] sm:$0xff]  ;;  %v123_v1 = vld [vmem:[#allocation7 + $0x8] sm:$0xff]  ;;  %vm126_vm0 = vcmask 130048   ;;  %vm209_vm1 = vcmask 261120  }
  0x1c   :  { %v124_v2 = vld [vmem:[#allocation8] sm:$0xff]  ;;  %144 = vmatpush.msra.mxu0 %v125_v0  ;;  %167 = vmatpush.msra.mxu1 %v123_v1  ;;  %v122_v3 = vld [vmem:[#allocation7] sm:$0xff]  ;;  %v121_v4 = vld [vmem:[#allocation5] sm:$0xff]  ;;  %s458_s13 = smov [#allocation13]  }
  0x1d   :  { %v120_v5 = vld [vmem:[#allocation2] sm:$0xff]  ;;  %v208_v6 = vld [vmem:[#allocation11 + $0x18] sm:$0xff]  ;;  %v207_v8 = vld [vmem:[#allocation11 + $0x10] sm:$0xff]  ;;  %s240_s14 = sshll.u32 %s458_s13, 4  ;;  %s241_s14 = int_to_ptr.vmem [resolvable:$true] %s240_s14 }
  0x1e   :  { %145 = vmatpush.msra.mxu0 %v124_v2  ;;  %168 = vmatpush.msra.mxu1 %v122_v3  ;;  %v180_v7 = vld [vmem:[#allocation10 + $0x8] sm:$0xff]  ;;  %v179_v9 = vld [vmem:[#allocation10] sm:$0xff]  ;;  %v206_v10 = vld [vmem:[#allocation11 + $0x8] sm:$0xff] }
  0x1f   :  { %255 = vmatmul.msk.f32.vlgmr.msra.gmra.mxu0 %vm126_vm0, %v121_v4  ;;  %256 = vmatmul.msk.f32.vlgmr.msra.gmra.mxu1 %vm126_vm0, %v120_v5  ;;  %v205_v11 = vld [vmem:[#allocation11] sm:$0xff] }
  0x20   :  { %225 = vmatpush.msra.mxu3 %v208_v6  ;;  %199 = vmatpush.msra.mxu2 %v180_v7  ;;  %v268_v12 = vld [vmem:[%s538_s4] ss:$0 sm:$0xff]  ;;  %s242_s4 = sshll.u32 %s542_s8, 4  ;;  %s243_s4 = int_to_ptr.hbm [resolvable:$true] %s242_s4 }
  0x21   :  { %v269_v18 = vld [vmem:[%s540_s6] ss:$0 sm:$0xff] }
  0x22   :  { %226 = vmatpush.msra.mxu3 %v207_v8  ;;  %200 = vmatpush.msra.mxu2 %v179_v9 }
  0x23   :  { %257 = vmatmul.msk.f32.vlgmr.msra.gmra.mxu2 %vm126_vm0, %v121_v4 }
  0x24   :  { %227 = vmatpush.msra.mxu3 %v206_v10 }
  0x26   :  { %228 = vmatpush.msra.mxu3 %v205_v11 }
  0x9c   :  { %v147_v13 = vpop.f32.mrf.mxu0  ;;  %v170_v14 = vpop.f32.mrf.mxu1 }
  0x9d   :  { %v171_v15 = vadd.f32 %v170_v14, %v147_v13 }
  0x9f   :  { %v177_v16 = vadd.f32 %v268_v12, %v171_v15 }
  0xa1   :  { %270 = vtanh.f32 %v177_v16 }
  0xa6   :  { %v202_v19 = vpop.f32.mrf.mxu2 }
  0xa7   :  { %v271_v17 = vpop.eup %270  ;;  %v203_v20 = vadd.f32 %v269_v18, %v202_v19 }
  0xa8   :  { %258 = vmatmul.msk.f32.vlgmr.msra.gmra.mxu3 %vm209_vm1, %v271_v17 }
 0x12b   :  { %v230_v21 = vpop.f32.mrf.mxu3 }
 0x12c   :  { %v233_v22 = vmul.f32 %v230_v21, %v203_v20 }
 0x12e   :  { %234 = vst.msk [vmem:[#allocation13] sm:$0xff] %vm209_vm1, %v233_v22 }
 0x12f   :  { %245 = dma.vmem_to_hbm [thread:$0]  %s241_s14, 128, %s243_s4, [#allocation4]  }
 0x130   :  { %448 = dma.done.wait [#allocation4], 128  }
 0x131   :  { %449 = vsyncadd [#allocation4], 4294967168 }
 0x132   :  { %250 = vsyncpa [#allocation3], 1 }
 0x133   :  { %251 = vsyncpa [#allocation6], 1 }
 0x134   :  { %252 = vsyncpa [#allocation9], 1 }
 0x135   :  { %253 = vsyncpa [#allocation12], 1 }
 0x136   :  { %254 = vsyncpa [#allocation4], 1 }

</bundles_post_ra>
